<compile_context>
chip_gen: v5e
topology: v5e:2x2
jax: 0.10.0
libtpu: 0.0.40
codegen_flags: <defaults>
</compile_context>

<pallas_src>
import jax
import jax.numpy as jnp
import numpy as np
from jax.experimental import pallas as pl
from jax.experimental.pallas import tpu as pltpu


def _pipeline_rel_kernel(enc_ref, pm_ref, ttag_ref, htag_ref,
                         w1_tr_ref, w1_tt_ref, w1_hr_ref, w1_ht_ref, b1_ref,
                         w2_ref, b2_ref, labels_ref,
                         logits_ref, loss_ref):
    """One grid step == one batch element (grid axis is 'parallel')."""
    L = enc_ref.shape[1]
    E = pm_ref.shape[1]
    num_rel = w2_ref.shape[1]

    enc = enc_ref[0]                       # [L, H]
    pm = pm_ref[0]                         # [E, 2L]
    tail_mask = pm[:, :L]                  # [E, L]
    head_mask = pm[:, L:]                  # [E, L]

    # bmm: span-mask weighted pooling of encoder states.
    tail_rep = jnp.dot(tail_mask, enc, preferred_element_type=jnp.float32)  # [E, H]
    head_rep = jnp.dot(head_mask, enc, preferred_element_type=jnp.float32)  # [E, H]

    # pair2rel: weights pre-split / pre-transposed in the wrapper, so the
    # concat(tail_rep, tail_tag, head_rep, head_tag) never materializes and
    # no in-kernel transpose is needed.
    h = (jnp.dot(tail_rep, w1_tr_ref[...], preferred_element_type=jnp.float32)
         + jnp.dot(ttag_ref[0], w1_tt_ref[...], preferred_element_type=jnp.float32)
         + jnp.dot(head_rep, w1_hr_ref[...], preferred_element_type=jnp.float32)
         + jnp.dot(htag_ref[0], w1_ht_ref[...], preferred_element_type=jnp.float32)
         + b1_ref[...])
    h = jnp.maximum(h, 0.0)                # relu; dropout == identity (eval)

    # classifier
    logits = (jnp.dot(h, w2_ref[...], preferred_element_type=jnp.float32)
              + b2_ref[...])               # [E, num_rel]
    logits_ref[0] = logits

    # Cross entropy, summed over pairs of this batch element; mean
    # normalization is done in the wrapper so there is no cross-grid-step
    # accumulator and the grid axis can be 'parallel'.
    lab = labels_ref[0]                    # [E, 1] int32
    m = jnp.max(logits, axis=-1, keepdims=True)
    z = logits - m
    lse = jnp.log(jnp.sum(jnp.exp(z), axis=-1, keepdims=True))       # [E, 1]
    onehot = (jax.lax.broadcasted_iota(jnp.int32, (E, num_rel), 1)
              == lab).astype(jnp.float32)                            # [E, num_rel]
    gold = jnp.sum(z * onehot, axis=-1, keepdims=True)               # [E, 1]
    loss_ref[...] = jnp.sum(lse - gold).reshape(1, 1, 1)


def pipeline_relation_pallas(enc, pair_mask, tail_tag, head_tag,
                             w1, b1, w2, b2, labels):
    """Returns (logits [B,E,num_rel], cross-entropy loss scalar)."""
    B, L, H = enc.shape
    E = pair_mask.shape[1]
    Eb = tail_tag.shape[-1]
    Rh, D = w1.shape
    num_rel = w2.shape[0]
    assert D == 2 * (H + Eb)
    assert pair_mask.shape == (B, E, 2 * L)

    # One-time weight layout plumbing (no in-kernel .T, no concat in HBM).
    # pooled column order: [tail_rep (H) | tail_tag (Eb) | head_rep (H) | head_tag (Eb)]
    w1_tr = jnp.transpose(w1[:, :H])                     # [H, Rh]
    w1_tt = jnp.transpose(w1[:, H:H + Eb])               # [Eb, Rh]
    w1_hr = jnp.transpose(w1[:, H + Eb:2 * H + Eb])      # [H, Rh]
    w1_ht = jnp.transpose(w1[:, 2 * H + Eb:])            # [Eb, Rh]
    w2_t = jnp.transpose(w2)                             # [Rh, num_rel]
    b1_2 = b1.reshape(1, Rh)
    b2_2 = b2.reshape(1, num_rel)
    labels3 = labels.astype(jnp.int32).reshape(B, E, 1)

    in_specs = [
        pl.BlockSpec((1, L, H), lambda b: (b, 0, 0)),        # enc
        pl.BlockSpec((1, E, 2 * L), lambda b: (b, 0, 0)),    # pair_mask
        pl.BlockSpec((1, E, Eb), lambda b: (b, 0, 0)),       # tail_tag
        pl.BlockSpec((1, E, Eb), lambda b: (b, 0, 0)),       # head_tag
        pl.BlockSpec((H, Rh), lambda b: (0, 0)),             # w1_tr
        pl.BlockSpec((Eb, Rh), lambda b: (0, 0)),            # w1_tt
        pl.BlockSpec((H, Rh), lambda b: (0, 0)),             # w1_hr
        pl.BlockSpec((Eb, Rh), lambda b: (0, 0)),            # w1_ht
        pl.BlockSpec((1, Rh), lambda b: (0, 0)),             # b1
        pl.BlockSpec((Rh, num_rel), lambda b: (0, 0)),       # w2
        pl.BlockSpec((1, num_rel), lambda b: (0, 0)),        # b2
        pl.BlockSpec((1, E, 1), lambda b: (b, 0, 0)),        # labels (int32)
    ]
    out_specs = (
        pl.BlockSpec((1, E, num_rel), lambda b: (b, 0, 0)),  # logits
        pl.BlockSpec((1, 1, 1), lambda b: (b, 0, 0)),        # per-batch loss sum
    )
    out_shapes = (
        jax.ShapeDtypeStruct((B, E, num_rel), jnp.float32),
        jax.ShapeDtypeStruct((B, 1, 1), jnp.float32),
    )

    logits, loss_b = pl.pallas_call(
        _pipeline_rel_kernel,
        out_shape=out_shapes,
        grid=(B,),
        in_specs=in_specs,
        out_specs=out_specs,
        compiler_params=pltpu.CompilerParams(
            dimension_semantics=("parallel",)),   # no resident accumulator
    )(enc, pair_mask, tail_tag, head_tag,
      w1_tr, w1_tt, w1_hr, w1_ht, b1_2, w2_t, b2_2, labels3)

    loss = jnp.sum(loss_b) / (B * E)              # CrossEntropyLoss 'mean'
    return logits, loss


def _reference(enc, pair_mask, tail_tag, head_tag, w1, b1, w2, b2, labels):
    """Plain-JAX mirror of PipelineRelation.forward (eval semantics)."""
    L = enc.shape[1]
    tail_mask = pair_mask[:, :, :L]
    head_mask = pair_mask[:, :, L:]
    tail_rep = jnp.einsum('bel,blh->beh', tail_mask, enc)
    head_rep = jnp.einsum('bel,blh->beh', head_mask, enc)
    pooled = jnp.concatenate([tail_rep, tail_tag, head_rep, head_tag], axis=-1)
    h = jnp.maximum(pooled @ w1.T + b1, 0.0)
    logits = h @ w2.T + b2
    m = jnp.max(logits, axis=-1, keepdims=True)
    lse = m[..., 0] + jnp.log(jnp.sum(jnp.exp(logits - m), axis=-1))
    gold = jnp.take_along_axis(logits, labels[..., None], axis=-1)[..., 0]
    loss = jnp.mean(lse - gold)
    return logits, loss


if __name__ == "__main__":
    # Small, module-consistent sizes.
    B, L = 2, 8              # batch, sequence length
    E = 8                    # number of entity pairs per example
    hidden_size = 32         # stand-in for 768
    ne_embed_size = 8        # stand-in for 32
    rel_hidden_size = 16     # stand-in for 256
    num_rel = 8
    num_ne = 4
    token_vocab = 64
    D = 2 * (hidden_size + ne_embed_size)

    key = jax.random.PRNGKey(0)
    ks = jax.random.split(key, 12)

    # "Parameters" (shapes from __init__).
    tok_emb_table = jax.random.normal(ks[0], (token_vocab, hidden_size),
                                      jnp.float32) * 0.1   # encoder stand-in
    ne_emb_table = jax.random.normal(ks[1], (num_ne, ne_embed_size),
                                     jnp.float32) * 0.1
    w1 = jax.random.uniform(ks[2], (rel_hidden_size, D), jnp.float32, -0.2, 0.2)
    b1 = jax.random.uniform(ks[3], (rel_hidden_size,), jnp.float32, -0.1, 0.1)
    w2 = jax.random.uniform(ks[4], (num_rel, rel_hidden_size), jnp.float32,
                            -0.2, 0.2)
    b2 = jax.random.uniform(ks[5], (num_rel,), jnp.float32, -0.1, 0.1)

    # Inputs.
    input_ix = jax.random.randint(ks[6], (B, L), 0, token_vocab)
    pair_tail = jax.random.randint(ks[7], (B, E), 0, num_ne)
    pair_head = jax.random.randint(ks[8], (B, E), 0, num_ne)
    labels = jax.random.randint(ks[9], (B, E), 0, num_rel)
    # pair_mask: per-pair soft span masks over [tail tokens | head tokens].
    raw_mask = jax.random.bernoulli(ks[10], 0.3, (B, E, 2 * L)).astype(jnp.float32)
    raw_mask = raw_mask.at[:, :, 0].set(1.0)      # ensure non-empty tail span
    raw_mask = raw_mask.at[:, :, L].set(1.0)      # ensure non-empty head span
    tail_norm = jnp.sum(raw_mask[:, :, :L], -1, keepdims=True)
    head_norm = jnp.sum(raw_mask[:, :, L:], -1, keepdims=True)
    pair_mask = jnp.concatenate(
        [raw_mask[:, :, :L] / tail_norm, raw_mask[:, :, L:] / head_norm], axis=-1)

    # Glue (embedding lookups done in plain JAX).
    enc = tok_emb_table[input_ix]          # stand-in for self.encoder(...)[0]
    tail_tag = ne_emb_table[pair_tail]     # self.ne_embed(pair_tail)
    head_tag = ne_emb_table[pair_head]     # self.ne_embed(pair_head)

    logits, loss = pipeline_relation_pallas(
        enc, pair_mask, tail_tag, head_tag, w1, b1, w2, b2, labels)
    jax.block_until_ready((logits, loss))

    # Sanity check against the plain-JAX reference.
    logits_r, loss_r = _reference(
        enc, pair_mask, tail_tag, head_tag, w1, b1, w2, b2, labels)
    np.testing.assert_allclose(np.asarray(logits), np.asarray(logits_r),
                               rtol=1e-3, atol=1e-3)
    np.testing.assert_allclose(float(loss), float(loss_r),
                               rtol=1e-3, atol=1e-3)

    print("KERNEL_OK")
</pallas_src>

<mosaic_0001>
module attributes {stable_mosaic.version = 11 : i64} {
  func.func @_pipeline_rel_kernel(%arg0: i32, %arg1: memref<1x8x32xf32, #tpu.memory_space<vmem>>, %arg2: memref<1x8x16xf32, #tpu.memory_space<vmem>>, %arg3: memref<1x8x8xf32, #tpu.memory_space<vmem>>, %arg4: memref<1x8x8xf32, #tpu.memory_space<vmem>>, %arg5: memref<32x16xf32, #tpu.memory_space<vmem>>, %arg6: memref<8x16xf32, #tpu.memory_space<vmem>>, %arg7: memref<32x16xf32, #tpu.memory_space<vmem>>, %arg8: memref<8x16xf32, #tpu.memory_space<vmem>>, %arg9: memref<1x16xf32, #tpu.memory_space<vmem>>, %arg10: memref<16x8xf32, #tpu.memory_space<vmem>>, %arg11: memref<1x8xf32, #tpu.memory_space<vmem>>, %arg12: memref<1x8x1xi32, #tpu.memory_space<vmem>>, %arg13: memref<1x8x8xf32, #tpu.memory_space<vmem>>, %arg14: memref<1x1x1xf32, #tpu.memory_space<vmem>>) attributes {dimension_semantics = [#tpu.dimension_semantics<parallel>], iteration_bounds = array<i64: 2>, scalar_prefetch = 0 : i64, scratch_operands = 0 : i64, tpu.core_type = #tpu.core_type<tc>, window_params = [{transform_indices = @transform_0, window_bounds = array<i64: 1, 8, 32>}, {transform_indices = @transform_1, window_bounds = array<i64: 1, 8, 16>}, {transform_indices = @transform_2, window_bounds = array<i64: 1, 8, 8>}, {transform_indices = @transform_3, window_bounds = array<i64: 1, 8, 8>}, {pipeline_mode = #tpu.pipeline_mode<synchronous>, transform_indices = @transform_4, window_bounds = array<i64: 32, 16>}, {pipeline_mode = #tpu.pipeline_mode<synchronous>, transform_indices = @transform_5, window_bounds = array<i64: 8, 16>}, {pipeline_mode = #tpu.pipeline_mode<synchronous>, transform_indices = @transform_6, window_bounds = array<i64: 32, 16>}, {pipeline_mode = #tpu.pipeline_mode<synchronous>, transform_indices = @transform_7, window_bounds = array<i64: 8, 16>}, {pipeline_mode = #tpu.pipeline_mode<synchronous>, transform_indices = @transform_8, window_bounds = array<i64: 1, 16>}, {pipeline_mode = #tpu.pipeline_mode<synchronous>, transform_indices = @transform_9, window_bounds = array<i64: 16, 8>}, {pipeline_mode = #tpu.pipeline_mode<synchronous>, transform_indices = @transform_10, window_bounds = array<i64: 1, 8>}, {transform_indices = @transform_11, window_bounds = array<i64: 1, 8, 1>}, {transform_indices = @transform_12, window_bounds = array<i64: 1, 8, 8>}, {transform_indices = @transform_13, window_bounds = array<i64: 1, 1, 1>}]} {
    %c0 = arith.constant 0 : index
    %c0_0 = arith.constant 0 : index
    %c0_1 = arith.constant 0 : index
    %0 = vector.load %arg1[%c0, %c0_0, %c0_1] : memref<1x8x32xf32, #tpu.memory_space<vmem>>, vector<1x8x32xf32>
    %1 = vector.shape_cast %0 : vector<1x8x32xf32> to vector<8x32xf32>
    %c0_2 = arith.constant 0 : index
    %c0_3 = arith.constant 0 : index
    %c0_4 = arith.constant 0 : index
    %2 = vector.load %arg2[%c0_2, %c0_3, %c0_4] : memref<1x8x16xf32, #tpu.memory_space<vmem>>, vector<1x8x16xf32>
    %3 = vector.shape_cast %2 : vector<1x8x16xf32> to vector<8x16xf32>
    %4 = vector.extract_strided_slice %3 {offsets = [0, 0], sizes = [8, 8], strides = [1, 1]} : vector<8x16xf32> to vector<8x8xf32>
    %5 = vector.extract_strided_slice %3 {offsets = [0, 8], sizes = [8, 8], strides = [1, 1]} : vector<8x16xf32> to vector<8x8xf32>
    %cst = arith.constant dense<0.000000e+00> : vector<8x32xf32>
    %6 = tpu.matmul %4, %1, %cst {dimension_numbers = #tpu.dot_dimension_numbers<[1], [0], [0], [1], [0, 0, 1, 1], [], []>} : vector<8x8xf32>, vector<8x32xf32>, vector<8x32xf32> -> vector<8x32xf32>
    %cst_5 = arith.constant dense<0.000000e+00> : vector<8x32xf32>
    %7 = tpu.matmul %5, %1, %cst_5 {dimension_numbers = #tpu.dot_dimension_numbers<[1], [0], [0], [1], [0, 0, 1, 1], [], []>} : vector<8x8xf32>, vector<8x32xf32>, vector<8x32xf32> -> vector<8x32xf32>
    %c0_6 = arith.constant 0 : index
    %c0_7 = arith.constant 0 : index
    %8 = vector.load %arg5[%c0_6, %c0_7] : memref<32x16xf32, #tpu.memory_space<vmem>>, vector<32x16xf32>
    %cst_8 = arith.constant dense<0.000000e+00> : vector<8x16xf32>
    %9 = tpu.matmul %6, %8, %cst_8 {dimension_numbers = #tpu.dot_dimension_numbers<[1], [0], [0], [1], [0, 0, 1, 1], [], []>} : vector<8x32xf32>, vector<32x16xf32>, vector<8x16xf32> -> vector<8x16xf32>
    %c0_9 = arith.constant 0 : index
    %c0_10 = arith.constant 0 : index
    %c0_11 = arith.constant 0 : index
    %10 = vector.load %arg3[%c0_9, %c0_10, %c0_11] : memref<1x8x8xf32, #tpu.memory_space<vmem>>, vector<1x8x8xf32>
    %11 = vector.shape_cast %10 : vector<1x8x8xf32> to vector<8x8xf32>
    %c0_12 = arith.constant 0 : index
    %c0_13 = arith.constant 0 : index
    %12 = vector.load %arg6[%c0_12, %c0_13] : memref<8x16xf32, #tpu.memory_space<vmem>>, vector<8x16xf32>
    %cst_14 = arith.constant dense<0.000000e+00> : vector<8x16xf32>
    %13 = tpu.matmul %11, %12, %cst_14 {dimension_numbers = #tpu.dot_dimension_numbers<[1], [0], [0], [1], [0, 0, 1, 1], [], []>} : vector<8x8xf32>, vector<8x16xf32>, vector<8x16xf32> -> vector<8x16xf32>
    %14 = arith.addf %9, %13 : vector<8x16xf32>
    %c0_15 = arith.constant 0 : index
    %c0_16 = arith.constant 0 : index
    %15 = vector.load %arg7[%c0_15, %c0_16] : memref<32x16xf32, #tpu.memory_space<vmem>>, vector<32x16xf32>
    %cst_17 = arith.constant dense<0.000000e+00> : vector<8x16xf32>
    %16 = tpu.matmul %7, %15, %cst_17 {dimension_numbers = #tpu.dot_dimension_numbers<[1], [0], [0], [1], [0, 0, 1, 1], [], []>} : vector<8x32xf32>, vector<32x16xf32>, vector<8x16xf32> -> vector<8x16xf32>
    %17 = arith.addf %14, %16 : vector<8x16xf32>
    %c0_18 = arith.constant 0 : index
    %c0_19 = arith.constant 0 : index
    %c0_20 = arith.constant 0 : index
    %18 = vector.load %arg4[%c0_18, %c0_19, %c0_20] : memref<1x8x8xf32, #tpu.memory_space<vmem>>, vector<1x8x8xf32>
    %19 = vector.shape_cast %18 : vector<1x8x8xf32> to vector<8x8xf32>
    %c0_21 = arith.constant 0 : index
    %c0_22 = arith.constant 0 : index
    %20 = vector.load %arg8[%c0_21, %c0_22] : memref<8x16xf32, #tpu.memory_space<vmem>>, vector<8x16xf32>
    %cst_23 = arith.constant dense<0.000000e+00> : vector<8x16xf32>
    %21 = tpu.matmul %19, %20, %cst_23 {dimension_numbers = #tpu.dot_dimension_numbers<[1], [0], [0], [1], [0, 0, 1, 1], [], []>} : vector<8x8xf32>, vector<8x16xf32>, vector<8x16xf32> -> vector<8x16xf32>
    %22 = arith.addf %17, %21 : vector<8x16xf32>
    %c0_24 = arith.constant 0 : index
    %c0_25 = arith.constant 0 : index
    %23 = vector.load %arg9[%c0_24, %c0_25] : memref<1x16xf32, #tpu.memory_space<vmem>>, vector<1x16xf32>
    %24 = vector.broadcast %23 : vector<1x16xf32> to vector<8x16xf32>
    %25 = arith.addf %22, %24 : vector<8x16xf32>
    %cst_26 = arith.constant 0.000000e+00 : f32
    %26 = vector.broadcast %cst_26 : f32 to vector<8x16xf32>
    %27 = arith.maximumf %25, %26 : vector<8x16xf32>
    %c0_27 = arith.constant 0 : index
    %c0_28 = arith.constant 0 : index
    %28 = vector.load %arg10[%c0_27, %c0_28] : memref<16x8xf32, #tpu.memory_space<vmem>>, vector<16x8xf32>
    %cst_29 = arith.constant dense<0.000000e+00> : vector<8x8xf32>
    %29 = tpu.matmul %27, %28, %cst_29 {dimension_numbers = #tpu.dot_dimension_numbers<[1], [0], [0], [1], [0, 0, 1, 1], [], []>} : vector<8x16xf32>, vector<16x8xf32>, vector<8x8xf32> -> vector<8x8xf32>
    %c0_30 = arith.constant 0 : index
    %c0_31 = arith.constant 0 : index
    %30 = vector.load %arg11[%c0_30, %c0_31] : memref<1x8xf32, #tpu.memory_space<vmem>>, vector<1x8xf32>
    %31 = vector.broadcast %30 : vector<1x8xf32> to vector<8x8xf32>
    %32 = arith.addf %29, %31 : vector<8x8xf32>
    %c0_32 = arith.constant 0 : index
    %c0_33 = arith.constant 0 : index
    %c0_34 = arith.constant 0 : index
    %33 = vector.load %arg13[%c0_32, %c0_33, %c0_34] : memref<1x8x8xf32, #tpu.memory_space<vmem>>, vector<1x8x8xf32>
    %34 = vector.shape_cast %33 : vector<1x8x8xf32> to vector<8x8xf32>
    %35 = vector.shape_cast %32 : vector<8x8xf32> to vector<1x8x8xf32>
    tpu.vector_store %arg13[%c0_32, %c0_33, %c0_34], %35 {strides = array<i32>} : memref<1x8x8xf32, #tpu.memory_space<vmem>>, vector<1x8x8xf32>,
    %c0_35 = arith.constant 0 : index
    %c0_36 = arith.constant 0 : index
    %c0_37 = arith.constant 0 : index
    %36 = vector.load %arg12[%c0_35, %c0_36, %c0_37] : memref<1x8x1xi32, #tpu.memory_space<vmem>>, vector<1x8x1xi32>
    %37 = vector.shape_cast %36 : vector<1x8x1xi32> to vector<8x1xi32>
    %cst_38 = arith.constant dense<0xFF800000> : vector<8xf32>
    %38 = vector.multi_reduction <maximumf>, %32, %cst_38 [1] : vector<8x8xf32> to vector<8xf32>
    %39 = vector.shape_cast %38 : vector<8xf32> to vector<8x1xf32>
    %40 = vector.broadcast %39 : vector<8x1xf32> to vector<8x8xf32>
    %41 = arith.subf %32, %40 : vector<8x8xf32>
    %42 = math.exp %41 : vector<8x8xf32>
    %cst_39 = arith.constant dense<0.000000e+00> : vector<8xf32>
    %43 = vector.multi_reduction <add>, %42, %cst_39 [1] : vector<8x8xf32> to vector<8xf32>
    %44 = vector.shape_cast %43 : vector<8xf32> to vector<8x1xf32>
    %45 = math.log %44 : vector<8x1xf32>
    %46 = tpu.iota {dimensions = array<i32: 1>} : vector<8x8xi32>
    %47 = vector.broadcast %37 : vector<8x1xi32> to vector<8x8xi32>
    %48 = arith.cmpi eq, %46, %47 : vector<8x8xi32>
    %49 = arith.extui %48 : vector<8x8xi1> to vector<8x8xi32>
    %50 = arith.sitofp %49 : vector<8x8xi32> to vector<8x8xf32>
    %51 = arith.mulf %41, %50 : vector<8x8xf32>
    %cst_40 = arith.constant dense<0.000000e+00> : vector<8xf32>
    %52 = vector.multi_reduction <add>, %51, %cst_40 [1] : vector<8x8xf32> to vector<8xf32>
    %53 = vector.shape_cast %52 : vector<8xf32> to vector<8x1xf32>
    %54 = arith.subf %45, %53 : vector<8x1xf32>
    %55 = vector.shape_cast %54 : vector<8x1xf32> to vector<1x8x1xf32>
    %cst_41 = arith.constant dense<0.000000e+00> : vector<1xf32>
    %56 = vector.multi_reduction <add>, %55, %cst_41 [1, 2] : vector<1x8x1xf32> to vector<1xf32>
    %57 = vector.shape_cast %56 : vector<1xf32> to vector<1x1x1xf32>
    %58 = vector.extract %57[0, 0, 0] : f32 from vector<1x1x1xf32>
    %59 = vector.broadcast %58 : f32 to vector<1x1x1xf32>
    %c0_42 = arith.constant 0 : index
    %c0_43 = arith.constant 0 : index
    %c0_44 = arith.constant 0 : index
    %60 = vector.load %arg14[%c0_42, %c0_43, %c0_44] : memref<1x1x1xf32, #tpu.memory_space<vmem>>, vector<1x1x1xf32>
    tpu.vector_store %arg14[%c0_42, %c0_43, %c0_44], %59 {strides = array<i32>} : memref<1x1x1xf32, #tpu.memory_space<vmem>>, vector<1x1x1xf32>,
    return
  }
  func.func @transform_0(%arg0: i32) -> (i32, i32, i32) {
    %c0_i32 = arith.constant 0 : i32
    %c0_i32_0 = arith.constant 0 : i32
    %c0_i32_1 = arith.constant 0 : i32
    return %arg0, %c0_i32, %c0_i32_0 : i32, i32, i32
  }
  func.func @transform_1(%arg0: i32) -> (i32, i32, i32) {
    %c0_i32 = arith.constant 0 : i32
    %c0_i32_0 = arith.constant 0 : i32
    %c0_i32_1 = arith.constant 0 : i32
    return %arg0, %c0_i32, %c0_i32_0 : i32, i32, i32
  }
  func.func @transform_2(%arg0: i32) -> (i32, i32, i32) {
    %c0_i32 = arith.constant 0 : i32
    %c0_i32_0 = arith.constant 0 : i32
    %c0_i32_1 = arith.constant 0 : i32
    return %arg0, %c0_i32, %c0_i32_0 : i32, i32, i32
  }
  func.func @transform_3(%arg0: i32) -> (i32, i32, i32) {
    %c0_i32 = arith.constant 0 : i32
    %c0_i32_0 = arith.constant 0 : i32
    %c0_i32_1 = arith.constant 0 : i32
    return %arg0, %c0_i32, %c0_i32_0 : i32, i32, i32
  }
  func.func @transform_4(%arg0: i32) -> (i32, i32) {
    %c0_i32 = arith.constant 0 : i32
    %c0_i32_0 = arith.constant 0 : i32
    %c0_i32_1 = arith.constant 0 : i32
    return %c0_i32, %c0_i32_0 : i32, i32
  }
  func.func @transform_5(%arg0: i32) -> (i32, i32) {
    %c0_i32 = arith.constant 0 : i32
    %c0_i32_0 = arith.constant 0 : i32
    %c0_i32_1 = arith.constant 0 : i32
    return %c0_i32, %c0_i32_0 : i32, i32
  }
  func.func @transform_6(%arg0: i32) -> (i32, i32) {
    %c0_i32 = arith.constant 0 : i32
    %c0_i32_0 = arith.constant 0 : i32
    %c0_i32_1 = arith.constant 0 : i32
    return %c0_i32, %c0_i32_0 : i32, i32
  }
  func.func @transform_7(%arg0: i32) -> (i32, i32) {
    %c0_i32 = arith.constant 0 : i32
    %c0_i32_0 = arith.constant 0 : i32
    %c0_i32_1 = arith.constant 0 : i32
    return %c0_i32, %c0_i32_0 : i32, i32
  }
  func.func @transform_8(%arg0: i32) -> (i32, i32) {
    %c0_i32 = arith.constant 0 : i32
    %c0_i32_0 = arith.constant 0 : i32
    %c0_i32_1 = arith.constant 0 : i32
    return %c0_i32, %c0_i32_0 : i32, i32
  }
  func.func @transform_9(%arg0: i32) -> (i32, i32) {
    %c0_i32 = arith.constant 0 : i32
    %c0_i32_0 = arith.constant 0 : i32
    %c0_i32_1 = arith.constant 0 : i32
    return %c0_i32, %c0_i32_0 : i32, i32
  }
  func.func @transform_10(%arg0: i32) -> (i32, i32) {
    %c0_i32 = arith.constant 0 : i32
    %c0_i32_0 = arith.constant 0 : i32
    %c0_i32_1 = arith.constant 0 : i32
    return %c0_i32, %c0_i32_0 : i32, i32
  }
  func.func @transform_11(%arg0: i32) -> (i32, i32, i32) {
    %c0_i32 = arith.constant 0 : i32
    %c0_i32_0 = arith.constant 0 : i32
    %c0_i32_1 = arith.constant 0 : i32
    return %arg0, %c0_i32, %c0_i32_0 : i32, i32, i32
  }
  func.func @transform_12(%arg0: i32) -> (i32, i32, i32) {
    %c0_i32 = arith.constant 0 : i32
    %c0_i32_0 = arith.constant 0 : i32
    %c0_i32_1 = arith.constant 0 : i32
    return %arg0, %c0_i32, %c0_i32_0 : i32, i32, i32
  }
  func.func @transform_13(%arg0: i32) -> (i32, i32, i32) {
    %c0_i32 = arith.constant 0 : i32
    %c0_i32_0 = arith.constant 0 : i32
    %c0_i32_1 = arith.constant 0 : i32
    return %arg0, %c0_i32, %c0_i32_0 : i32, i32, i32
  }
}

</mosaic_0001>

<bundles_post_ra>
// kernel: tpu_custom_call.1
= control target key start
LH: loop header
LB: loop body
LE: loop exit
PB: predicated region body
PF: predicated region fallthrough
CT: control target
= control target key end

     0   :  { %s1277_s0 = inlined_call_operand.vmem [shape: f32[2,8,32], index: 0, kind: input, shape index: {}]   ;;  %s1278_s1 = inlined_call_operand.vmem [shape: f32[2,8,16], index: 1, kind: input, shape index: {}]   ;;  %s1279_s2 = inlined_call_operand.vmem [shape: f32[2,8,8], index: 2, kind: input, shape index: {}]   ;;  %s1280_s3 = inlined_call_operand.vmem [shape: f32[2,8,8], index: 3, kind: input, shape index: {}]   ;;  %s1281_s4 = inlined_call_operand.vmem [shape: f32[32,16], index: 4, kind: input, shape index: {}]   ;;  %s1282_s5 = inlined_call_operand.vmem [shape: f32[8,16], index: 5, kind: input, shape index: {}]   ;;  %s1283_s6 = inlined_call_operand.vmem [shape: f32[32,16], index: 6, kind: input, shape index: {}]   ;;  %s1284_s7 = inlined_call_operand.vmem [shape: f32[8,16], index: 7, kind: input, shape index: {}]   ;;  %s1285_s8 = inlined_call_operand.vmem [shape: f32[1,16], index: 8, kind: input, shape index: {}]   ;;  %s1286_s9 = inlined_call_operand.vmem [shape: f32[16,8], index: 9, kind: input, shape index: {}]   ;;  %s1287_s10 = inlined_call_operand.vmem [shape: f32[1,8], index: 10, kind: input, shape index: {}]   ;;  %s1288_s11 = inlined_call_operand.vmem [shape: s32[2,8,1], index: 11, kind: input, shape index: {}]   ;;  %s1289_s12 = inlined_call_operand.hbm [shape: f32[2,8,8], index: 12, kind: output, shape index: {0}]   ;;  %s1290_s13 = inlined_call_operand.vmem [shape: f32[2,1,1], index: 13, kind: output, shape index: {1}]  }
   0x1   :  { %1294 = sst [smem:[#allocation8_spill]] %s1277_s0 }
   0x2   :  { %1295 = sst [smem:[#allocation9_spill]] %s1278_s1 }
   0x3   :  { %1296 = sst [smem:[#allocation10_spill]] %s1279_s2 }
   0x4   :  { %1297 = sst [smem:[#allocation11_spill]] %s1280_s3 }
   0x5   :  { %19 = vsyncpa [#allocation3], 0 }
   0x6   :  { %21 = vsyncpa [#allocation3 + $0x1], 0  ;;  %s1105_s25 = smov 0   ;;  %s1107_s26 = smov 0  }
   0x7   :  { %s1109_s27 = smov 0   ;;  %s1111_s28 = smov 0  }
   0x8 LB: > { %1298 = sst [smem:[#allocation5_spill]] %s1026_s27  ;;  %s1126_s29 = sadd.s32 4294967295, %s1030_s28   ;;  %s1030_s28 = sphi %s1111_s28, %s1307_s28   ;;  %s1026_s27 = sphi %s1109_s27, %s1309_s27   ;;  %s1022_s26 = sphi %s1107_s26, %s1311_s26   ;;  %s1018_s25 = sphi %s1105_s25, %s1310_s25  }
   0x9   : > { %s894_s30 = sadd.s32 4294967294, %s1030_s28   ;;  %s1130_s14 = sadd.s32 1, %s1030_s28  }
   0xa   : > { %1299 = sst [smem:[#allocation6_spill]] %s1130_s14  ;;  %s311_s15 = sadd.s32 1, %s1026_s27 }
   0xb   : > { %s308_s16 = ssub.s32 %s1030_s28, %s1130_s14  ;;  %p321_p0 = scmp.ne.s32.totalorder %s1026_s27, %s1022_s26 }
   0xc   : > { %p309_p1 = scmp.eq.s32.totalorder %s308_s16, 0  ;;  %p322_p2 = scmp.eq.s32.totalorder %s1126_s29, 1 }
   0xd   : > { %p327_p3 = scmp.ne.s32.totalorder %s1022_s26, %s1018_s25  ;;  %p328_p4 = scmp.eq.s32.totalorder %s894_s30, 1 }
   0xe   : > { %s1141_s17 = scalar_select %p309_p1, %s1026_s27, %s311_s15  }
   0xf   : > { %p1143_p5 = por %p322_p2, %p321_p0  ;;  %p1147_p6 = por %p328_p4, %p327_p3 }
  0x10   : > { %1300 = sst [smem:[#allocation7_spill]] %s1141_s17  ;;  %p897_p7 = scmp.ge.s32.totalorder %s1030_s28, 1 }
  0x11   : > { %p428_p8 = scmp.lt.s32.totalorder %s1030_s28, 3 }
  0x13   : > { %p429_p9 = pnand %p897_p7, %p428_p8 }
  0x14   : > { %p490_p10 = scmp.lt.s32.totalorder (!%p429_p9), %s1126_s29, 1  ;;  %s1303_s1 = sld [smem:[#allocation9_spill]] (!%p429_p9) }
  0x15   : > { %432 = sbr.rel (%p429_p9) target bundleno = 977 (0x3d1), region = 68  ;;  %s1304_s0 = sld [smem:[#allocation8_spill]] (!%p429_p9) }
  0x16   : > { %s1032_s17 = smov (!%p429_p9), 120   ;;  %s1305_s2 = sld [smem:[#allocation10_spill]] (!%p429_p9) }
  0x17   : > { %s1306_s3 = sld [smem:[#allocation11_spill]] (!%p429_p9)  ;;  %s482_s22 = sand.u32 (!%p429_p9), 1, %s1022_s26  }
  0x18   : > { %s1229_s15 = sshll.u32 (!%p429_p9), %s482_s22, 3 }
  0x1a   : > { %s1155_s20 = scalar_select %p490_p10, %s1126_s29, 1  ;;  %vm515_vm0 = vcmask 64512   ;;  %v566_v2 = vld [vmem:[%s1281_s4 + $0x18] sm:$0xff]  ;;  %v565_v3 = vld [vmem:[%s1281_s4 + $0x10] sm:$0xff]  ;;  %v564_v4 = vld [vmem:[%s1281_s4 + $0x8] sm:$0xff]  ;;  %vm592_vm1 = vcmask 261120   ;;  %v719_v35 = vlaneseq }
  0x1b   : > { %608 = vmatpush.msra.mxu3 %v566_v2  ;;  %v568_v5 = vld [vmem:[%s1282_s5] sm:$0xff]  ;;  %v619_v8 = vld [vmem:[%s1283_s6 + $0x18] sm:$0xff]  ;;  %v618_v9 = vld [vmem:[%s1283_s6 + $0x10] sm:$0xff]  ;;  %vm682_vm2 = vcmask 130048   ;;  %v1033_v29 = vmov 0   ;;  %v1034_v38 = vmov 0.0  }
  0x1c   : > { %s1158_s21 = sshll.u32 %s1155_s20, 3  ;;  %v563_v6 = vld [vmem:[%s1281_s4] sm:$0xff]  ;;  %587 = vmatpush.msra.mxu2 %v568_v5  ;;  %v617_v11 = vld [vmem:[%s1283_s6 + $0x8] sm:$0xff]  ;;  %960 = vset.pattern.permute.xlu1 %v1033_v29  ;;  %v720_v36 = vand.u32 127, %v719_v35  ;;  %vm732_vm4 = vcmask 7168  }
  0x1d   : > { %s497_s24 = scalar_lea.vmem %s1303_s1, %s1158_s21  ;;  %s493_s16 = scalar_lea.vmem %s1304_s0, %s1158_s21  ;;  %609 = vmatpush.msra.mxu3 %v565_v3  ;;  %v645_v10 = vld [vmem:[%s1284_s7] sm:$0xff]  ;;  %v677_v17 = vld [vmem:[%s1286_s9 + $0x8] sm:$0xff]  ;;  %961 = vset.pattern.permute.xlu0 %v1033_v29 }
  0x1e   : > { %v514_v0 = vld [vmem:[%s497_s24] sm:$0xff]  ;;  %s505_s23 = scalar_lea.vmem %s1306_s3, %s1158_s21  ;;  %700 = vmatpush.msrb.mxu2 %v677_v17  ;;  %s509_s14 = scalar_lea.vmem %s1288_s11, %s1158_s21 }
  0x1f   : > { %v513_v1 = vld [vmem:[%s493_s16] sm:$0xff]  ;;  %539 = vrot.lane.b32.xlu0 %v514_v0, %s1032_s17  ;;  %610 = vmatpush.msra.mxu3 %v564_v4  ;;  %s501_s16 = scalar_lea.vmem %s1305_s2, %s1158_s21  ;;  %s484_s21 = scalar_lea.vmem [#allocation2], %s1229_s15 }
  0x20   : > { %534 = vmatpush.msra.mxu0 %v513_v1  ;;  %558 = vmatpush.msra.mxu1 %v513_v1  ;;  %v567_v7 = vld [vmem:[%s501_s16] sm:$0xff]  ;;  %s913_s17 = sshll.u32 %s1126_s29, 3  ;;  %s762_s16 = sshll.u32 %s484_s21, 4  ;;  %s763_s16 = int_to_ptr.vmem [resolvable:$true] %s762_s16 }
  0x21   : > { %904 = vmatmul.msk.f32.vlgmr.msra.gmra.mxu0 %vm515_vm0, %v514_v0  ;;  %611 = vmatpush.msra.mxu3 %v563_v6  ;;  %v616_v12 = vld [vmem:[%s1283_s6] sm:$0xff]  ;;  %s760_s1 = scalar_lea.hbm %s1289_s12, %s913_s17  ;;  %s988_s3 = scalar_lea.hbm %s1289_s12, 16 }
  0x22   : > { %906 = vmatmul.msk.f32.vlgmr.msra.gmra.mxu2 %vm515_vm0, %v567_v7  ;;  %635 = vmatpush.msrb.mxu0 %v619_v8  ;;  %v644_v15 = vld [vmem:[%s505_s23] sm:$0xff]  ;;  %s764_s27 = sshll.u32 %s760_s1, 4  ;;  %s765_s27 = int_to_ptr.hbm [resolvable:$true] %s764_s27 }
  0x23   : > { %664 = vmatpush.msrb.mxu1 %v645_v10  ;;  %v676_v18 = vld [vmem:[%s1286_s9] sm:$0xff]  ;;  %s982_s23 = sshra.s32 %s765_s27, 4  ;;  %s983_s23 = int_to_ptr.hbm [resolvable:$true] %s982_s23 }
  0x24   : > { %636 = vmatpush.msrb.mxu0 %v618_v9  ;;  %701 = vmatpush.msrb.mxu2 %v676_v18  ;;  %v962_v25 = vld [vmem:[%s1285_s8] ss:$0 sm:$0xff]  ;;  %s984_s30 = scalar_lea.hbm %s983_s23, 8  ;;  %p989_p0 = scmp.lt.s32.totalorder %s983_s23, %s1289_s12 }
  0x25   : > { %v707_v30 = vld [vmem:[%s509_s14] sm:$0xff]  ;;  %s747_s14 = scalar_lea.sflag [#allocation3], %s482_s22  ;;  %p985_p11 = scmp.ne.s32.totalorder %s983_s23, %s984_s30 }
  0x26   : > { %637 = vmatpush.msrb.mxu0 %v617_v11  ;;  %722 = vperm.xlu1 %960, %v707_v30   ;;  %v963_v31 = vld [vmem:[%s1287_s10] ss:$0 sm:$0xff]  ;;  %p990_p1 = scmp.lt.s32.totalorder %s988_s3, %s984_s30 }
  0x27   : > { %p986_p12 = pnand %p985_p11, %p1143_p5 }
  0x28   : > { %638 = vmatpush.msrb.mxu0 %v616_v12  ;;  %p991_p2 = por %p990_p1, %p989_p0 }
  0x29   : > { %p987_p13 = pneg %p986_p12 }
  0x2b   : > { %p992_p3 = pnand %p991_p2, %p987_p13 }
  0x91   : > { %v540_v13 = vpop.permute.xlu0 %539 }
  0x92   : > { %905 = vmatmul.msk.f32.vlgmr.msra.gmra.mxu1 %vm515_vm0, %v540_v13 }
  0x98   : > { %v723_v37 = vpop.permute.xlu1 %722 }
  0x99   : > { %vm724_vm3 = vcmp.eq.s32.totalorder %v720_v36, %v723_v37 }
  0x9a   : > { %909 = vmatmul.msk.f32.vlgmr.msrb.gmra.mxu1 %vm515_vm0, %v644_v15  ;;  %v911_v39 = vsel %vm724_vm3, 1.0, %v1034_v38 }
  0x9e   : > { %v536_v14 = vpop.f32.mrf.mxu0 }
  0x9f   : > { %907 = vmatmul.msk.f32.vlgmr.msra.gmra.mxu3 %vm592_vm1, %v536_v14 }
  0xa5   : > { %v589_v19 = vpop.f32.mrf.mxu2 }
 0x10f   : > { %v560_v16 = vpop.f32.mrf.mxu1 }
 0x110   : > { %908 = vmatmul.msk.f32.vlgmr.msrb.gmra.mxu0 %vm592_vm1, %v560_v16 }
 0x117   : > { %v666_v23 = vpop.f32.mrf.mxu1 }
 0x122   : > { %v613_v20 = vpop.f32.mrf.mxu3 }
 0x123   : > { %v614_v21 = vadd.f32 %v613_v20, %v589_v19 }
 0x18d   : > { %v640_v22 = vpop.f32.mrf.mxu0 }
 0x18e   : > { %v643_v24 = vadd.f32 %v640_v22, %v614_v21 }
 0x190   : > { %v669_v26 = vadd.f32 %v666_v23, %v643_v24 }
 0x192   : > { %v674_v27 = vadd.f32 %v962_v25, %v669_v26 }
 0x194   : > { %v675_v28 = vmax.f32 %v674_v27, 0.0 }
 0x196   : > { %910 = vmatmul.msk.f32.vlgmr.msrb.gmra.mxu2 %vm682_vm2, %v675_v28 }
 0x219   : > { %v703_v32 = vpop.f32.mrf.mxu2 }
 0x21a   : > { %v704_v33 = vadd.f32 %v963_v31, %v703_v32 }
 0x21c   : > { %v708_v34 = vsel %vm515_vm0, %v704_v33, -inf  ;;  %706 = vst.msk [vmem:[%s484_s21] sm:$0xff] %vm515_vm0, %v704_v33 }
 0x21d   : > { %709 = vmax.xlane.f32.xlu0 %v708_v34 }
 0x290   : > { %v710_v40 = vpop.xlane.xlu0 %709 }
 0x291   : > { %v711_v41 = vsub.f32 %v704_v33, %v710_v40 }
 0x293   : > { %v712_v42 = vmul.f32 1.442695, %v711_v41  ;;  %v727_v43 = vmul.f32 %v911_v39, %v711_v41 }
 0x295   : > { %964 = vpow2.f32 %v712_v42  ;;  %v728_v44 = vsel %vm515_vm0, %v727_v43, 0.0 }
 0x296   : > { %729 = vadd.xlane.f32.xlu2 %v728_v44 }
 0x29b   : > { %v965_v45 = vpop.eup %964 }
 0x29c   : > { %v714_v46 = vsel %vm515_vm0, %v965_v45, 0.0 }
 0x29d   : > { %715 = vadd.xlane.f32.xlu1 %v714_v46 }
 0x309   : > { %v730_v50 = vpop.xlane.xlu2 %729 }
 0x310   : > { %v716_v47 = vpop.xlane.xlu1 %715 }
 0x311   : > { %966 = vlog2.f32 %v716_v47 }
 0x317   : > { %v967_v48 = vpop.eup %966 }
 0x318   : > { %v718_v49 = vmul.f32 0.6931472, %v967_v48 }
 0x31a   : > { %v731_v51 = vsub.f32 %v718_v49, %v730_v50 }
 0x31c   : > { %v733_v52 = vsel %vm732_vm4, %v731_v51, 0.0 }
 0x31d   : > { %734 = vadd.xlane.f32.xlu2 %v733_v52 }
 0x31e   : > { %995 = shalt.err (!%p992_p3)
}
 0x31f   : > { %918 = dma.vmem_to_hbm [thread:$0]  (%p1143_p5), %s763_s16, 128, %s765_s27, %s747_s14   ;;  %vm744_vm5 = vcmask 0  }
 0x320   : > { %s512_s15 = scalar_lea.vmem %s1290_s13, %s1155_s20 }
 0x390   : > { %v735_v53 = vpop.xlane.xlu2 %734 }
 0x391   : > { %v736_v54 = vrot.slane %v735_v53, 4 }
 0x393   : > { %v737_v55 = vadd.f32 %v736_v54, %v735_v53 }
 0x395   : > { %v738_v56 = vrot.slane %v737_v55, 2 }
 0x397   : > { %v739_v57 = vadd.f32 %v738_v56, %v737_v55 }
 0x399   : > { %v740_v58 = vrot.slane %v739_v57, 1 }
 0x39b   : > { %v741_v59 = vadd.f32 %v740_v58, %v739_v57 }
 0x39d   : > { %916 = vpush %v741_v59 }
 0x3ce   : > { %s917_s3 = spop %916 }
 0x3cf   : > { %v743_v60 = vstv %s917_s3 }
 0x3d0   : > { %745 = vst.msk [vmem:[%s512_s15] sm:$0x1] %vm744_vm5, %v743_v60 }
 0x3d1 PF: > { %p924_p4 = scmp.ge.s32.totalorder %s1030_s28, 2  ;;  %s779_s18 = sand.u32 1, %s1018_s25  }
 0x3d2   : > { %s780_s21 = scalar_lea.sflag [#allocation3], %s779_s18 }
 0x3d3   : > { %p921_p5 = pnand %p924_p4, %p1147_p6 }
 0x3d5   : > { %p922_p7 = pneg %p921_p5 }
 0x3d7   : > { %1013 = dma.done.wait (%p922_p7), %s780_s21, 128  }
 0x3d8   : > { %1015 = vsyncadd (%p922_p7), %s780_s21, 4294967168  ;;  %s1307_s28 = sld [smem:[#allocation6_spill]]  ;;  %s1310_s25 = smov %s1022_s26 }
 0x3d9   : > { %s1308_s0 = sld [smem:[#allocation5_spill]] }
 0x3da   : > { %s1309_s27 = sld [smem:[#allocation7_spill]] }
 0x3de   : > { %p24_p8 = scmp.ge.s32.totalorder %s1307_s28, 4  }
 0x3df   : > { %s1311_s26 = smov %s1308_s0 }
 0x3e0   :  { %26 = sbr.rel (!%p24_p8) target bundleno = 8 (0x8), region = 127 }
 0x3e5   :  { %792 = vsyncpa [#allocation3], 1 }
 0x3e6   :  { %794 = vsyncpa [#allocation3 + $0x1], 1 }

</bundles_post_ra>
